<compile_context>
chip_gen: v5e
topology: v5e:2x2
jax: 0.10.0
libtpu: 0.0.40
codegen_flags: <defaults>
</compile_context>

<pallas_src>
import functools

import numpy as np
import jax
import jax.numpy as jnp
from jax import lax
from jax.experimental import pallas as pl
from jax.experimental.pallas import tpu as pltpu


def _stripe_rows(dtype) -> int:
    """Minimum sublane-aligned stripe height for the dtype's (x,128) tile."""
    return {4: 8, 2: 16, 1: 32}[jnp.dtype(dtype).itemsize]


@functools.cache
def _pltpu_roll_is_forward() -> bool:
    """One-time probe: True iff pltpu.roll matches jnp.roll (elem i -> i+shift).

    NOTE(perf feedback): deliberately kept as a tiny *compiled* probe rather
    than an interpret-mode one -- only the compiled Mosaic lowering's rotate
    convention matters for correctness, the probe is an (8,128) kernel, and
    the result is cached for the process lifetime (zero steady-state cost).
    """
    def k(x_ref, o_ref):
        o_ref[...] = pltpu.roll(x_ref[...], 1, 1)

    x = jnp.broadcast_to(jnp.arange(128, dtype=jnp.float32), (8, 128))
    y = pl.pallas_call(k, out_shape=jax.ShapeDtypeStruct((8, 128), jnp.float32))(x)
    return bool(y[0, 1] == x[0, 0])


def _choose_rows_per_block(B, T, itemsize, *, stripe,
                           target_block_bytes=1 << 20, max_rows=512):
    """Rows per grid step.

    Targets ~1 MiB of waveform per step (amortizes the ~0.35 us fixed per-step
    pipeline overhead -> 80-90% of HBM roofline), is a multiple of the sublane
    stripe, capped at 512 rows, and capped so the batch still yields >=2 grid
    steps (v7x megacore) whenever the batch is big enough.
    """
    bytes_per_row = max(T * itemsize, 1)
    r = (target_block_bytes // bytes_per_row) // stripe * stripe
    r = max(stripe, min(r, max_rows))
    b8 = -(-B // stripe) * stripe               # batch rounded up to the stripe
    if b8 >= 2 * stripe:                        # keep >=2 blocks for 2 TCs (v7x)
        r = min(r, b8 // 2 // stripe * stripe)
    return max(min(r, b8), stripe)


def _roll_kernel(shift_ref, x_ref, o_ref, *, stripe_rows: int):
    """Per-row circular time-shift of an (R, T) block.

    out[r, t] = x[r, (t - s[r]) mod T]     (torch.roll(x_r, s[r]) semantics)

    Barrel shifter: for each bit k of the per-row shift (in [0, T)), rotate the
    row by 2^k along the lane axis (static amount -> cheap XLU / whole-vreg
    moves for amounts >= 128), gated by a per-row select.  The block is
    processed in vreg-resident `stripe_rows`-row stripes so no stage
    round-trips VMEM.  Shifts live in SMEM (scalar prefetch).
    """
    R, T = x_ref.shape
    nbits = (T - 1).bit_length()                # static; ceil(log2(T))
    row0 = pl.program_id(0) * R                 # first batch row of this block
    num_stripes = R // stripe_rows
    row_ids = lax.broadcasted_iota(jnp.int32, (stripe_rows, 1), 0)  # hoisted

    def stripe_body(si, carry):
        r0 = pl.multiple_of(si * stripe_rows, stripe_rows)
        # Build the (stripe_rows, 1) shift vector from SMEM-resident scalars.
        s = jnp.zeros((stripe_rows, 1), jnp.int32)
        for j in range(stripe_rows):
            s = jnp.where(row_ids == j, shift_ref[row0 + r0 + j], s)
        y = x_ref[pl.ds(r0, stripe_rows), :]    # one stripe: T/128 vregs
        for k in range(nbits):                  # static trip count
            amt = 1 << k
            rolled = pltpu.roll(y, amt, 1)      # static rotation along lanes
            y = jnp.where((s & amt) != 0, rolled, y)
        o_ref[pl.ds(r0, stripe_rows), :] = y
        return carry

    lax.fori_loop(0, num_stripes, stripe_body, 0, unroll=(num_stripes <= 4))


def roll_rows_pallas(x, shifts):
    """Per-row circular roll along time (torch.roll semantics).

    x: (B, T) waveforms; shifts: (B,) integer (any sign; canonicalized mod T).
    """
    B, T = x.shape
    itemsize = jnp.dtype(x.dtype).itemsize
    stripe = _stripe_rows(x.dtype)

    shifts = jnp.mod(shifts.astype(jnp.int32), T)          # contract: [0, T)
    if not _pltpu_roll_is_forward():                       # direction fix-up
        shifts = jnp.mod(T - shifts, T)

    rows = _choose_rows_per_block(B, T, itemsize, stripe=stripe)
    Bp = -(-B // rows) * rows
    if Bp != B:                                            # pad batch; shift 0
        x = jnp.pad(x, ((0, Bp - B), (0, 0)))
        shifts = jnp.pad(shifts, (0, Bp - B))

    # TODO(synk): T % 128 != 0 relies on Mosaic's logical-length rotation
    # (correct, but edge-masked and slower); not exercised by the demo below.
    nbits = max((T - 1).bit_length(), 1)
    block_bytes = rows * T * itemsize
    # Explicit scoped-VMEM budget: 2 buffers x (in + out) x block + headroom.
    vmem_limit = int(min(48 * 2**20, max(8 * 2**20, 6 * block_bytes + (2 << 20))))

    out = pl.pallas_call(
        functools.partial(_roll_kernel, stripe_rows=stripe),
        out_shape=jax.ShapeDtypeStruct((Bp, T), x.dtype),
        grid_spec=pltpu.PrefetchScalarGridSpec(
            num_scalar_prefetch=1,                          # shifts -> SMEM, copied once
            grid=(Bp // rows,),
            in_specs=[pl.BlockSpec((rows, T), lambda i, s: (i, 0))],
            out_specs=pl.BlockSpec((rows, T), lambda i, s: (i, 0)),
        ),
        compiler_params=pltpu.CompilerParams(
            dimension_semantics=("parallel",),
            vmem_limit_bytes=vmem_limit),
        cost_estimate=pl.CostEstimate(
            flops=2 * Bp * T * nbits,                       # rotates/selects (cheap)
            transcendentals=0,
            bytes_accessed=2 * Bp * T * itemsize + Bp * 4), # memory-bound
    )(shifts, x)
    return out[:B]


def sample_shifts(key, batch, num_samples, *, min_shift, max_shift, p):
    """Mirrors Shift.randomize_parameters: fraction-of-length integer shift,
    applied per example with probability p; canonicalized to [0, T)
    (rollover=True).  Distribution-matched, not bit-identical to torch RNG."""
    min_s = int(round(min_shift * num_samples))
    max_s = int(round(max_shift * num_samples))
    k_shift, k_apply = jax.random.split(key)
    raw = jax.random.randint(k_shift, (batch,), min_s, max_s + 1)
    applied = jax.random.bernoulli(k_apply, p, (batch,))
    shifts = jnp.where(applied, raw, 0)
    return jnp.mod(shifts, num_samples).astype(jnp.int32)


def unlabeled_shift_augmentor(x, key, *, min_shift=-0.15, max_shift=0.15, p=0.5):
    """JAX/Pallas port of UnlabeledShiftAugmentor.forward (train mode).

    'b t -> b 1 t' and back are layout no-ops for the shift, so the kernel
    operates directly on (B, T).  Per example: with probability p, circularly
    shift (rollover) by an integer number of samples drawn uniformly from
    [round(min_shift*T), round(max_shift*T)].  sample_rate=16000 is metadata.
    """
    B, T = x.shape
    shifts = sample_shifts(key, B, T, min_shift=min_shift, max_shift=max_shift, p=p)
    return roll_rows_pallas(x, shifts), shifts


if __name__ == "__main__":
    # Small "b t" waveform batch; block sizing keeps 2 grid steps here so both
    # v7x TensorCores get work.
    B, T = 16, 1024
    key = jax.random.PRNGKey(0)
    k_data, k_aug = jax.random.split(key)
    x = jax.random.normal(k_data, (B, T), dtype=jnp.float32)

    out, shifts = unlabeled_shift_augmentor(x, k_aug)
    out = jax.block_until_ready(out)

    # Reference: per-row np.roll with the same sampled shifts (torch.roll).
    x_np = np.asarray(x)
    s_np = np.asarray(shifts)
    expected = np.stack([np.roll(x_np[i], int(s_np[i])) for i in range(B)])
    assert out.shape == (B, T) and out.dtype == x.dtype
    np.testing.assert_array_equal(np.asarray(out), expected)

    # Batch-padding path (B not a multiple of the sublane stripe), fixed shifts.
    B2 = 5
    x2 = jax.random.normal(jax.random.PRNGKey(2), (B2, T), dtype=jnp.float32)
    s2 = jnp.array([3, 0, 1000, 511, 128], dtype=jnp.int32)
    out2 = jax.block_until_ready(roll_rows_pallas(x2, s2))
    exp2 = np.stack([np.roll(np.asarray(x2)[i], int(s2[i])) for i in range(B2)])
    np.testing.assert_array_equal(np.asarray(out2), exp2)

    print("KERNEL_OK")
</pallas_src>

<mosaic_0001>
module attributes {stable_mosaic.version = 11 : i64} {
  func.func @k(%arg0: memref<8x128xf32, #tpu.memory_space<vmem>>, %arg1: memref<8x128xf32, #tpu.memory_space<vmem>>) attributes {dimension_semantics = [], scalar_prefetch = 0 : i64, scratch_operands = 0 : i64, tpu.core_type = #tpu.core_type<tc>} {
    %c0 = arith.constant 0 : index
    %c0_0 = arith.constant 0 : index
    %0 = vector.load %arg0[%c0, %c0_0] : memref<8x128xf32, #tpu.memory_space<vmem>>, vector<8x128xf32>
    %c1_i32 = arith.constant 1 : i32
    %1 = tpu.dynamic_rotate %0 by %c1_i32 dim 1 : vector<8x128xf32>, i32 -> vector<8x128xf32>
    %c0_1 = arith.constant 0 : index
    %c0_2 = arith.constant 0 : index
    %2 = vector.load %arg1[%c0_1, %c0_2] : memref<8x128xf32, #tpu.memory_space<vmem>>, vector<8x128xf32>
    tpu.vector_store %arg1[%c0_1, %c0_2], %1 {strides = array<i32>} : memref<8x128xf32, #tpu.memory_space<vmem>>, vector<8x128xf32>,
    return
  }
}

</mosaic_0001>

<bundles_post_ra>
// kernel: tpu_custom_call.1
= control target key start
LH: loop header
LB: loop body
LE: loop exit
PB: predicated region body
PF: predicated region fallthrough
CT: control target
= control target key end

     0   :  { %6 = vsyncpa [#allocation3], 0  ;;  %s118_s0 = inlined_call_operand.hbm [shape: f32[8,128], index: 0, kind: input, shape index: {}]   ;;  %s119_s1 = inlined_call_operand.hbm [shape: f32[8,128], index: 1, kind: output, shape index: {}]  }
   0x1   :  { %7 = vsyncpa [#allocation4], 0  ;;  %s13_s8 = sshll.u32 %s118_s0, 4  ;;  %s99_s9 = smov [#allocation2]   ;;  %s14_s8 = int_to_ptr.hbm [resolvable:$true] %s13_s8 }
   0x2   :  { %s15_s10 = sshll.u32 %s99_s9, 4  ;;  %s16_s10 = int_to_ptr.vmem [resolvable:$true] %s15_s10 }
   0x3   :  { %18 = dma.hbm_to_vmem [thread:$0]  %s14_s8, 128, %s16_s10, [#allocation3]  }
   0x4   :  { %95 = dma.done.wait [#allocation3], 128  }
   0x5   :  { %96 = vsyncadd [#allocation3], 4294967168  ;;  %v23_v0 = vld [vmem:[#allocation2] sm:$0xff]  ;;  %s100_s11 = smov 1   ;;  %s101_s12 = smov [#allocation5]  }
   0x6   :  { %24 = vrot.lane.b32.xlu0 %v23_v0, %s100_s11  ;;  %s32_s13 = sshll.u32 %s101_s12, 4  ;;  %s34_s16 = sshll.u32 %s119_s1, 4  ;;  %s33_s13 = int_to_ptr.vmem [resolvable:$true] %s32_s13  ;;  %s35_s16 = int_to_ptr.hbm [resolvable:$true] %s34_s16 }
  0x78   :  { %v25_v1 = vpop.permute.xlu0 %24 }
  0x79   :  { %26 = vst [vmem:[#allocation5] sm:$0xff] %v25_v1 }
  0x7a   :  { %37 = dma.vmem_to_hbm [thread:$0]  %s33_s13, 128, %s35_s16, [#allocation4]  }
  0x7b   :  { %97 = dma.done.wait [#allocation4], 128  }
  0x7c   :  { %98 = vsyncadd [#allocation4], 4294967168 }
  0x7d   :  { %42 = vsyncpa [#allocation3], 1 }
  0x7e   :  { %43 = vsyncpa [#allocation4], 1 }

</bundles_post_ra>
